<compile_context>
chip_gen: v5e
topology: v5e:2x2
jax: 0.10.0
libtpu: 0.0.40
codegen_flags: <defaults>
</compile_context>

<pallas_src>
import numpy as np
import jax
import jax.numpy as jnp
from jax.experimental import pallas as pl
from jax.experimental.pallas import tpu as pltpu


# ---------------- MPO rank computation (mirrors MPO.compute_rank) -------------
def compute_mpo_ranks(in_shape, out_shape, trunc_num=None):
    n = len(in_shape)
    ranks = [1] * (n + 1)
    for s in range(1, n):
        rank_left, rank_right = 1, 1
        for i in range(0, s):
            rank_left *= in_shape[i] * out_shape[i]
        for i in range(s, n):
            rank_right *= in_shape[i] * out_shape[i]
        if trunc_num is None:
            ranks[s] = min(rank_left, rank_right)
        else:
            ranks[s] = min(int(trunc_num), rank_left, rank_right)
    return ranks


def _round_up(x, m):
    return ((x + m - 1) // m) * m


def _cdiv(a, b):
    return (a + b - 1) // b


def _device_vmem_bytes():
    try:
        return int(pltpu.get_tpu_info().vmem_capacity_bytes)
    except Exception:
        return 64 * 2 ** 20  # conservative (v7x per-TC VMEM)


# ---------------- Pallas kernels ----------------------------------------------
def _matmul_bias_kernel_f32out(x_ref, w_ref, b_ref, o_ref):
    # f32 output: accumulate directly into the resident output block.
    # x_ref: (tm, tk) [x dtype], w_ref: (tk, tn) [compute dtype], b_ref: (1, tn) f32
    @pl.when(pl.program_id(2) == 0)
    def _():
        o_ref[...] = jnp.broadcast_to(b_ref[...], o_ref.shape)

    o_ref[...] += jnp.dot(x_ref[...].astype(w_ref.dtype), w_ref[...],
                          preferred_element_type=jnp.float32)


def _matmul_bias_kernel_scratch(x_ref, w_ref, b_ref, o_ref, acc_ref):
    # Non-f32 output: f32 VMEM accumulator, bias folded into the k==0 init.
    @pl.when(pl.program_id(2) == 0)
    def _():
        acc_ref[...] = jnp.broadcast_to(b_ref[...], acc_ref.shape)

    acc_ref[...] += jnp.dot(x_ref[...].astype(w_ref.dtype), w_ref[...],
                            preferred_element_type=jnp.float32)

    @pl.when(pl.program_id(2) == pl.num_programs(2) - 1)
    def _():
        o_ref[...] = acc_ref[...].astype(o_ref.dtype)


# ---------------- glue: exact MPO.new_mpo2matrix contraction -------------------
def materialize_mpo_weight(tensor_set, in_features, out_features, compute_dtype):
    """Contract the tiny MPO cores into the dense (in, out) matrix, already in
    compute_dtype (no separate full-matrix cast pass). Cache/hoist this out of
    the per-call path when tensor_set is unchanged between calls."""
    # TODO(synk): exploit the factorized cores directly (chained small matmuls
    # against x) instead of materializing the dense matrix; the interleaved
    # new_mpo2matrix reshape makes that nontrivial, so it stays XLA glue.
    t = tensor_set[0].astype(compute_dtype)
    for i in range(1, len(tensor_set)):
        t = jnp.tensordot(t, tensor_set[i].astype(compute_dtype),
                          axes=([t.ndim - 1], [0]))
    return t.reshape(in_features, out_features)


# ---------------- forward ------------------------------------------------------
def mpo_linear_forward(x, tensor_set, bias, mpo_input_shape, mpo_output_shape, *,
                       tm=512, tn=1024, tk=1024,
                       compute_dtype=jnp.bfloat16, weight=None):
    in_features = int(np.prod(mpo_input_shape))
    out_features = int(np.prod(mpo_output_shape))
    compute_dtype = jnp.dtype(compute_dtype)
    out_dtype = x.dtype
    f32_out = jnp.dtype(out_dtype) == jnp.dtype(jnp.float32)

    if weight is None:
        weight = materialize_mpo_weight(tensor_set, in_features, out_features,
                                        compute_dtype)
    elif weight.dtype != compute_dtype:
        weight = weight.astype(compute_dtype)

    ori_shape = x.shape
    x2 = x.reshape(-1, in_features)
    M, K, N = x2.shape[0], in_features, out_features

    # ---- tile selection (MXU/lane aligned; full-dim blocks for tiny dims) -----
    SUB, LANE = 16, 128          # sublane alignment safe for f32 and bf16
    tm = M if M < SUB else min(tm, _round_up(M, SUB))
    tn = N if N < LANE else min(tn, _round_up(N, LANE))
    if K < LANE:
        tk, Kp = K, K
    else:
        tk = min(tk, _round_up(K, LANE))
        Kp = _round_up(K, tk)

    grid_i, grid_j = _cdiv(M, tm), _cdiv(N, tn)
    # Megacore occupancy (v7x has 2 TCs): keep >= 2 parallel blocks if possible.
    if grid_i * grid_j < 2:
        if N > LANE:
            tn = _round_up(_cdiv(N, 2), LANE)
            grid_j = _cdiv(N, tn)
        elif M > SUB:
            tm = _round_up(_cdiv(M, 2), SUB)
            grid_i = _cdiv(M, tm)
    grid_k = Kp // tk
    grid = (grid_i, grid_j, grid_k)

    # ---- only the K (reduction) axis needs zero padding -----------------------
    if Kp != K:
        x2 = jnp.pad(x2, ((0, 0), (0, Kp - K)))
        weight = jnp.pad(weight, ((0, Kp - K), (0, 0)))

    if bias is None:
        b2 = jnp.zeros((1, N), jnp.float32)
    else:
        b2 = bias.astype(jnp.float32).reshape(1, N)

    xb = jnp.dtype(x.dtype).itemsize
    cb = compute_dtype.itemsize
    ob = jnp.dtype(out_dtype).itemsize

    # VMEM: double-buffered inputs + (double-buffered) output (+ f32 acc if used)
    vmem_est = (2 * (tm * tk * xb + tk * tn * cb + tn * 4)
                + 2 * tm * tn * ob + (0 if f32_out else tm * tn * 4))
    vmem_cap = max(32 * 2 ** 20, _device_vmem_bytes() - 16 * 2 ** 20)
    vmem_limit = int(min(vmem_cap, max(32 * 2 ** 20, 2 * vmem_est)))

    # Truthful HBM traffic: A re-streamed grid_j times, B re-streamed grid_i times.
    cost = pl.CostEstimate(
        flops=2 * M * Kp * N,
        transcendentals=0,
        bytes_accessed=int(M * Kp * xb * grid_j + Kp * N * cb * grid_i
                           + M * N * ob + N * 4 * grid_i),
    )

    if f32_out:
        kernel = _matmul_bias_kernel_f32out
        scratch_shapes = []
    else:
        kernel = _matmul_bias_kernel_scratch
        scratch_shapes = [pltpu.VMEM((tm, tn), jnp.float32)]

    out = pl.pallas_call(
        kernel,
        out_shape=jax.ShapeDtypeStruct((M, N), out_dtype),
        grid_spec=pltpu.PrefetchScalarGridSpec(
            num_scalar_prefetch=0,
            grid=grid,
            in_specs=[
                pl.BlockSpec((tm, tk), lambda i, j, k: (i, k)),
                pl.BlockSpec((tk, tn), lambda i, j, k: (k, j)),
                pl.BlockSpec((1, tn), lambda i, j, k: (0, j)),
            ],
            out_specs=pl.BlockSpec((tm, tn), lambda i, j, k: (i, j)),
            scratch_shapes=scratch_shapes,
        ),
        compiler_params=pltpu.CompilerParams(
            dimension_semantics=("parallel", "parallel", "arbitrary"),
            vmem_limit_bytes=vmem_limit,
        ),
        cost_estimate=cost,
    )(x2, weight, b2)

    return out.reshape(tuple(ori_shape[:-1]) + (out_features,))


if __name__ == "__main__":
    key = jax.random.PRNGKey(0)

    # Small, consistent shapes.
    mpo_input_shape = [4, 8]    # prod = 32 = in_features
    mpo_output_shape = [8, 8]   # prod = 64 = out_features
    trunc_num = 4
    in_features = int(np.prod(mpo_input_shape))
    out_features = int(np.prod(mpo_output_shape))

    ranks = compute_mpo_ranks(mpo_input_shape, mpo_output_shape, trunc_num)

    # TODO(synk): the SVD-based matrix2mpo parameter initialization is init-time
    # setup only; here the MPO cores (shapes (r_i, in_i, out_i, r_{i+1}) with the
    # same truncated ranks) are initialized deterministically instead.
    keys = jax.random.split(key, len(mpo_input_shape) + 2)
    tensor_set = []
    for i in range(len(mpo_input_shape)):
        shp = (ranks[i], mpo_input_shape[i], mpo_output_shape[i], ranks[i + 1])
        tensor_set.append(0.1 * jax.random.normal(keys[i], shp, jnp.float32))
    bias = jax.random.normal(keys[-2], (out_features,), jnp.float32)

    # input: (batch=2, seq=8, in_features=32)
    x = jax.random.normal(keys[-1], (2, 8, in_features), jnp.float32)

    # Pure-JAX f32 reference of the exact forward semantics (new_mpo2matrix).
    t = tensor_set[0]
    for i in range(1, len(tensor_set)):
        t = jnp.tensordot(t, tensor_set[i], axes=([t.ndim - 1], [0]))
    m_ref = t.reshape(in_features, out_features)
    ref = (x.reshape(-1, in_features) @ m_ref + bias).reshape(2, 8, out_features)

    # Exact f32 compute path (tight tolerance).
    y32 = mpo_linear_forward(x, tensor_set, bias, mpo_input_shape,
                             mpo_output_shape, compute_dtype=jnp.float32)
    y32 = jax.block_until_ready(y32)
    assert y32.shape == (2, 8, out_features)
    np.testing.assert_allclose(np.asarray(y32), np.asarray(ref),
                               rtol=1e-5, atol=1e-5)

    # Default bf16 weight / f32-accumulate fast path (portable MXU path).
    y = mpo_linear_forward(x, tensor_set, bias, mpo_input_shape, mpo_output_shape)
    y = jax.block_until_ready(y)
    assert y.shape == (2, 8, out_features)
    np.testing.assert_allclose(np.asarray(y), np.asarray(ref),
                               rtol=2e-2, atol=2e-2)

    print("KERNEL_OK")
</pallas_src>

<mosaic_0001>
module attributes {stable_mosaic.version = 11 : i64} {
  func.func @_matmul_bias_kernel_f32out(%arg0: i32, %arg1: i32, %arg2: i32, %arg3: memref<16x32xf32, #tpu.memory_space<vmem>>, %arg4: memref<32x64xf32, #tpu.memory_space<vmem>>, %arg5: memref<1x64xf32, #tpu.memory_space<vmem>>, %arg6: memref<16x64xf32, #tpu.memory_space<vmem>>) attributes {dimension_semantics = [#tpu.dimension_semantics<parallel>, #tpu.dimension_semantics<parallel>, #tpu.dimension_semantics<arbitrary>], iteration_bounds = array<i64: 1, 1, 1>, scalar_prefetch = 0 : i64, scratch_operands = 0 : i64, tpu.core_type = #tpu.core_type<tc>, window_params = [{transform_indices = @transform_0, window_bounds = array<i64: 16, 32>}, {transform_indices = @transform_1, window_bounds = array<i64: 32, 64>}, {transform_indices = @transform_2, window_bounds = array<i64: 1, 64>}, {transform_indices = @transform_3, window_bounds = array<i64: 16, 64>}]} {
    %c0_i32 = arith.constant 0 : i32
    %0 = arith.cmpi eq, %arg2, %c0_i32 : i32
    %1 = arith.extui %0 : i1 to i32
    %c0_i32_0 = arith.constant 0 : i32
    %2 = arith.cmpi ne, %1, %c0_i32_0 : i32
    scf.if %2 {
      %c0_8 = arith.constant 0 : index
      %c0_9 = arith.constant 0 : index
      %9 = vector.load %arg5[%c0_8, %c0_9] : memref<1x64xf32, #tpu.memory_space<vmem>>, vector<1x64xf32>
      %10 = vector.shape_cast %9 : vector<1x64xf32> to vector<1x64xf32>
      %11 = vector.broadcast %10 : vector<1x64xf32> to vector<16x64xf32>
      %c0_10 = arith.constant 0 : index
      %c0_11 = arith.constant 0 : index
      %12 = vector.load %arg6[%c0_10, %c0_11] : memref<16x64xf32, #tpu.memory_space<vmem>>, vector<16x64xf32>
      tpu.vector_store %arg6[%c0_10, %c0_11], %11 {strides = array<i32>} : memref<16x64xf32, #tpu.memory_space<vmem>>, vector<16x64xf32>,
    } else {
    }
    %c0 = arith.constant 0 : index
    %c0_1 = arith.constant 0 : index
    %3 = vector.load %arg6[%c0, %c0_1] : memref<16x64xf32, #tpu.memory_space<vmem>>, vector<16x64xf32>
    %c0_2 = arith.constant 0 : index
    %c0_3 = arith.constant 0 : index
    %4 = vector.load %arg3[%c0_2, %c0_3] : memref<16x32xf32, #tpu.memory_space<vmem>>, vector<16x32xf32>
    %c0_4 = arith.constant 0 : index
    %c0_5 = arith.constant 0 : index
    %5 = vector.load %arg4[%c0_4, %c0_5] : memref<32x64xf32, #tpu.memory_space<vmem>>, vector<32x64xf32>
    %cst = arith.constant dense<0.000000e+00> : vector<16x64xf32>
    %6 = tpu.matmul %4, %5, %cst {dimension_numbers = #tpu.dot_dimension_numbers<[1], [0], [0], [1], [0, 0, 1, 1], [], []>} : vector<16x32xf32>, vector<32x64xf32>, vector<16x64xf32> -> vector<16x64xf32>
    %7 = arith.addf %3, %6 : vector<16x64xf32>
    %c0_6 = arith.constant 0 : index
    %c0_7 = arith.constant 0 : index
    %8 = vector.load %arg6[%c0_6, %c0_7] : memref<16x64xf32, #tpu.memory_space<vmem>>, vector<16x64xf32>
    tpu.vector_store %arg6[%c0_6, %c0_7], %7 {strides = array<i32>} : memref<16x64xf32, #tpu.memory_space<vmem>>, vector<16x64xf32>,
    return
  }
  func.func @transform_0(%arg0: i32, %arg1: i32, %arg2: i32) -> (i32, i32) {
    %c0_i32 = arith.constant 0 : i32
    return %arg0, %arg2 : i32, i32
  }
  func.func @transform_1(%arg0: i32, %arg1: i32, %arg2: i32) -> (i32, i32) {
    %c0_i32 = arith.constant 0 : i32
    return %arg2, %arg1 : i32, i32
  }
  func.func @transform_2(%arg0: i32, %arg1: i32, %arg2: i32) -> (i32, i32) {
    %c0_i32 = arith.constant 0 : i32
    %c0_i32_0 = arith.constant 0 : i32
    return %c0_i32, %arg1 : i32, i32
  }
  func.func @transform_3(%arg0: i32, %arg1: i32, %arg2: i32) -> (i32, i32) {
    %c0_i32 = arith.constant 0 : i32
    return %arg0, %arg1 : i32, i32
  }
}

</mosaic_0001>

<bundles_post_ra>
// kernel: tpu_custom_call.1
= control target key start
LH: loop header
LB: loop body
LE: loop exit
PB: predicated region body
PF: predicated region fallthrough
CT: control target
= control target key end

     0   :  { %8 = vsyncpa [#allocation3], 0  ;;  %s261_s0 = inlined_call_operand.hbm [shape: f32[16,32], index: 0, kind: input, shape index: {}]   ;;  %s262_s1 = inlined_call_operand.hbm [shape: f32[32,64], index: 1, kind: input, shape index: {}]   ;;  %s263_s2 = inlined_call_operand.vmem [shape: f32[1,64], index: 2, kind: input, shape index: {}]   ;;  %s264_s3 = inlined_call_operand.hbm [shape: f32[16,64], index: 3, kind: output, shape index: {}]  }
   0x1   :  { %9 = vsyncpa [#allocation6], 0 }
   0x2   :  { %10 = vsyncpa [#allocation4], 0  ;;  %s15_s14 = sshll.u32 %s261_s0, 4  ;;  %s211_s15 = smov [#allocation2]   ;;  %s16_s14 = int_to_ptr.hbm [resolvable:$true] %s15_s14 }
   0x3   :  { %s17_s16 = sshll.u32 %s211_s15, 4  ;;  %s28_s19 = sshll.u32 %s262_s1, 4  ;;  %s18_s16 = int_to_ptr.vmem [resolvable:$true] %s17_s16  ;;  %s29_s19 = int_to_ptr.hbm [resolvable:$true] %s28_s19 }
   0x4   :  { %s212_s20 = smov 128   ;;  %s213_s21 = smov 8  }
   0x5   :  { %23 = dma.hbm_to_vmem [thread:$0]  %s16_s14, 256, %s18_s16, [#allocation3], %s212_s20, %s212_s20, %s213_s21  }
   0x6   :  { %s214_s22 = smov [#allocation5]  }
   0x7   :  { %s30_s23 = sshll.u32 %s214_s22, 4  ;;  %s31_s23 = int_to_ptr.vmem [resolvable:$true] %s30_s23 }
   0x8   :  { %36 = dma.hbm_to_vmem [thread:$0]  %s29_s19, 512, %s31_s23, [#allocation6], %s212_s20, %s212_s20, %s213_s21  }
   0x9   :  { %205 = dma.done.wait [#allocation3], 256  }
   0xa   :  { %206 = vsyncadd [#allocation3], 4294967040 }
   0xb   :  { %207 = dma.done.wait [#allocation6], 512  }
   0xc   :  { %208 = vsyncadd [#allocation6], 4294966784  ;;  %v65_v0 = vld [vmem:[#allocation5 + $0x18] sm:$0xff]  ;;  %v64_v1 = vld [vmem:[#allocation5 + $0x10] sm:$0xff]  ;;  %vm55_vm0 = vcmask 523264   ;;  %vm66_vm1 = vcmask 261120  }
   0xd   :  { %85 = vmatpush.msra.mxu0 %v65_v0  ;;  %123 = vmatpush.msra.mxu1 %v65_v0  ;;  %v63_v2 = vld [vmem:[#allocation5 + $0x8] sm:$0xff]  ;;  %v132_v3 = vld [vmem:[%s263_s2] ss:$0 sm:$0xff]  ;;  %v62_v4 = vld [vmem:[#allocation5] sm:$0xff]  ;;  %s215_s24 = smov [#allocation7]   ;;  %s107_s27 = sshll.u32 %s264_s3, 4  ;;  %s108_s27 = int_to_ptr.hbm [resolvable:$true] %s107_s27 }
   0xe   :  { %56 = vst.msk [vmem:[#allocation7] sm:$0xff] %vm55_vm0, %v132_v3  ;;  %v60_v5 = vld [vmem:[#allocation2] sm:$0xff]  ;;  %v61_v6 = vld [vmem:[#allocation2 + $0x8] sm:$0xff]  ;;  %s105_s2 = sshll.u32 %s215_s24, 4  ;;  %s106_s2 = int_to_ptr.vmem [resolvable:$true] %s105_s2 }
   0xf   :  { %86 = vmatpush.msra.mxu0 %v64_v1  ;;  %124 = vmatpush.msra.mxu1 %v64_v1  ;;  %57 = vst.msk [vmem:[#allocation7 + $0x8] sm:$0xff] %vm55_vm0, %v132_v3 }
  0x11   :  { %87 = vmatpush.msra.mxu0 %v63_v2  ;;  %125 = vmatpush.msra.mxu1 %v63_v2 }
  0x13   :  { %88 = vmatpush.msra.mxu0 %v62_v4  ;;  %126 = vmatpush.msra.mxu1 %v62_v4 }
  0x14   :  { %121 = vmatmul.msk.f32.vlgmr.msra.gmra.mxu0 %vm66_vm1, %v60_v5  ;;  %122 = vmatmul.msk.f32.vlgmr.msra.gmra.mxu1 %vm66_vm1, %v61_v6 }
  0x15   :  { %v58_v7 = vld [vmem:[#allocation7] sm:$0xff] }
  0x16   :  { %v59_v8 = vld [vmem:[#allocation7 + $0x8] sm:$0xff] }
  0x91   :  { %v90_v9 = vpop.f32.mrf.mxu0  ;;  %v93_v10 = vpop.f32.mrf.mxu1 }
  0x92   :  { %v96_v11 = vadd.f32 %v90_v9, %v58_v7  ;;  %v97_v12 = vadd.f32 %v93_v10, %v59_v8 }
  0x94   :  { %99 = vst.msk [vmem:[#allocation7] sm:$0xff] %vm55_vm0, %v96_v11 }
  0x95   :  { %100 = vst.msk [vmem:[#allocation7 + $0x8] sm:$0xff] %vm55_vm0, %v97_v12 }
  0x96   :  { %113 = dma.vmem_to_hbm [thread:$0]  %s106_s2, 256, %s108_s27, [#allocation4], %s212_s20, %s212_s20, %s213_s21  }
  0x97   :  { %209 = dma.done.wait [#allocation4], 256  }
  0x98   :  { %210 = vsyncadd [#allocation4], 4294967040 }
  0x99   :  { %118 = vsyncpa [#allocation3], 1 }
  0x9a   :  { %119 = vsyncpa [#allocation6], 1 }
  0x9b   :  { %120 = vsyncpa [#allocation4], 1 }

</bundles_post_ra>
